<compile_context>
chip_gen: v7x
topology: tpu7x:2x2x1
jax: 0.10.0
libtpu: 0.0.40
codegen_flags: <defaults>
</compile_context>

<pallas_src>
import functools

import numpy as np

import jax
import jax.numpy as jnp
from jax import lax
from jax.experimental import pallas as pl
from jax.experimental.pallas import tpu as pltpu

LANES = 128          # lane width (last dim)
SUB = 8              # sublanes per vreg == rows per in-kernel chunk
CHUNK_UNROLL = 8     # fori_loop unroll; TP is rounded to SUB * CHUNK_UNROLL


def _hist_body(e_ref, x_ref, m_ref, o_ref, *, K, NE, TP, W,
               shared_edges, use_bf16):
    """Accumulate per-bin partial sums of 2*phi_k into o_ref[0, k] (8, 128)."""
    ti = pl.program_id(1)

    @pl.when(ti == 0)
    def _():
        o_ref[...] = jnp.zeros_like(o_ref)

    inv2w = jnp.float32(0.5 / W)
    # Hoist SMEM scalar reads out of the chunk loop (static indices).
    edges = [e_ref[j] for j in range(NE)]
    sent = e_ref[NE]                       # saturating sentinel, in s-space

    def tanh_of(a):
        if use_bf16:                       # optional (v6e/v7x): bf16 EUP path
            return jnp.tanh(a.astype(jnp.bfloat16)).astype(jnp.float32)
        return jnp.tanh(a)

    nchunks = TP // SUB

    def chunk(c, acc):
        r0 = pl.multiple_of(c * SUB, SUB)
        s = x_ref[pl.ds(r0, SUB), :] * inv2w          # (8, 128): 1 vreg
        if m_ref is not None:
            m = m_ref[pl.ds(r0, SUB), :]
            s = jnp.where(m != 0, s, sent)            # masked-out -> saturate
        new = []
        if shared_edges:
            # phi2_k = tanh(s + E_k) - tanh(s + E_{k+1});  K+1 tanh per chunk.
            t_prev = tanh_of(s + edges[0])
            for k in range(K):
                t_cur = tanh_of(s + edges[k + 1])
                new.append(acc[k] + (t_prev - t_cur))
                t_prev = t_cur
        else:
            # General (non-uniform mu_k): 2 tanh per bin.
            for k in range(K):
                phi2 = tanh_of(s + edges[2 * k]) - tanh_of(s + edges[2 * k + 1])
                new.append(acc[k] + phi2)
        return tuple(new)

    acc0 = tuple(jnp.zeros((SUB, LANES), jnp.float32) for _ in range(K))
    acc = lax.fori_loop(0, nchunks, chunk, acc0,
                        unroll=min(CHUNK_UNROLL, nchunks))

    for k in range(K):                     # K vreg read-modify-writes per step
        o_ref[0, k, :, :] += acc[k]


def _hist_kernel_nomask(e_ref, x_ref, o_ref, **cfg):
    _hist_body(e_ref, x_ref, None, o_ref, **cfg)


def _hist_kernel_masked(e_ref, x_ref, m_ref, o_ref, **cfg):
    _hist_body(e_ref, x_ref, m_ref, o_ref, **cfg)


def _tensorcores_per_chip():
    """2 only on v7x-class chips (2 TensorCores); v5e/v6e have 1."""
    try:
        kind = jax.devices()[0].device_kind.lower()
    except Exception:
        return 1
    if "v7" in kind or "7x" in kind:
        return 2
    return 1


def _mu_is_uniform(mu_k, K, L):
    """Host check: bin centers spaced by (almost exactly) L?  False if traced."""
    try:
        mu = np.asarray(jax.device_get(mu_k), dtype=np.float64).reshape(-1)
    except Exception:
        return False                      # tracer: cannot decide -> safe path
    if mu.shape[0] != K:
        return False
    if K <= 1:
        return True
    tol = 1e-6 * max(abs(float(L)), 1e-30)
    return bool(np.all(np.abs(np.diff(mu) - float(L)) <= tol))


def single_dim_hist_layer(x, mu_k, K, L, W, mask=None, *,
                          uniform_bins=None, use_bf16_tanh=False):
    """Pallas equivalent of SingleDimHistLayer.forward(x, mask).

    x: any shape (e.g. NCHW).  mask: optional, same shape/numel as x.
    Returns array of shape (1, 1, K), float32.
    uniform_bins: force/disable the shared-edge (K+1 tanh) path; None = auto.
    use_bf16_tanh: optional bf16 transcendentals (v6e/v7x only; ~1e-3 accuracy).
    """
    K = int(K)
    L = float(L)
    W = float(W)

    xf = x.reshape(-1).astype(jnp.float32)
    M = xf.shape[0]

    # Normalizer computed outside the kernel (not in the hot loop).
    if mask is None:
        mf = None
        N = jnp.float32(M)
    else:
        mf = mask.reshape(-1).astype(jnp.float32)
        N = jnp.sum(mf)   # NOTE: all-zero mask -> NaN, matches torch semantics

    shared = (uniform_bins if uniform_bins is not None
              else _mu_is_uniform(mu_k, K, L))

    mu1 = jnp.asarray(mu_k, jnp.float32).reshape(K)
    inv2w = jnp.float32(0.5 / W)
    if shared:
        # K+1 shared edges: E_j = (L/2 - mu_j)/(2W), E_K = (-L/2 - mu_{K-1})/(2W)
        edges = jnp.concatenate(
            [(0.5 * L - mu1), jnp.array([-0.5 * L], jnp.float32) - mu1[-1:]]
        ) * inv2w
        NE = K + 1
    else:
        hi = (0.5 * L - mu1) * inv2w
        lo = (-0.5 * L - mu1) * inv2w
        edges = jnp.stack([hi, lo], axis=1).reshape(2 * K)
        NE = 2 * K

    # Saturating sentinel (s = x/(2W) space): tanh(sent + E_j) == 1.0f for all
    # edges, so sentinel (padding / masked-out) elements contribute exactly 0.
    sent_s = jnp.float32(20.0) + jnp.max(jnp.abs(edges))
    esmem = jnp.concatenate([edges, sent_s.reshape(1)]).astype(jnp.float32)
    big_x = (sent_s * jnp.float32(2.0 * W)).astype(jnp.float32)  # x-space

    # Tiling: rows of 128 lanes, up to 1024 rows (512 KiB f32) per grid step.
    rows = -(-M // LANES)
    row_quant = SUB * CHUNK_UNROLL                    # 64
    TP = min(1024, ((rows + row_quant - 1) // row_quant) * row_quant)
    num_tiles = -(-rows // TP)
    n_shards = 2 if (_tensorcores_per_chip() >= 2 and num_tiles >= 2) else 1
    num_tiles = ((num_tiles + n_shards - 1) // n_shards) * n_shards
    nt = num_tiles // n_shards                        # tiles per shard
    total_padded = num_tiles * TP * LANES
    pad = total_padded - M
    # TODO(synk): int32 indexing would overflow past ~2^31 elements (theoretical).

    if pad:
        xf = jnp.concatenate([xf, jnp.broadcast_to(big_x, (pad,))])
    x2 = xf.reshape(num_tiles * TP, LANES)

    row_spec = pl.BlockSpec((TP, LANES), lambda p, t, e: (p * nt + t, 0))
    out_spec = pl.BlockSpec((1, K, SUB, LANES), lambda p, t, e: (p, 0, 0, 0))
    out_shape = jax.ShapeDtypeStruct((n_shards, K, SUB, LANES), jnp.float32)
    cparams = pltpu.CompilerParams(
        dimension_semantics=("parallel", "arbitrary"))
    cfg = dict(K=K, NE=NE, TP=TP, W=W,
               shared_edges=bool(shared), use_bf16=bool(use_bf16_tanh))

    if mf is None:
        acc = pl.pallas_call(
            functools.partial(_hist_kernel_nomask, **cfg),
            out_shape=out_shape,
            grid_spec=pltpu.PrefetchScalarGridSpec(
                num_scalar_prefetch=1,
                grid=(n_shards, nt),
                in_specs=[row_spec],
                out_specs=out_spec,
            ),
            compiler_params=cparams,
        )(esmem, x2)
    else:
        m2 = jnp.pad(mf, (0, pad)).reshape(num_tiles * TP, LANES)  # pad mask=0
        acc = pl.pallas_call(
            functools.partial(_hist_kernel_masked, **cfg),
            out_shape=out_shape,
            grid_spec=pltpu.PrefetchScalarGridSpec(
                num_scalar_prefetch=1,
                grid=(n_shards, nt),
                in_specs=[row_spec, row_spec],
                out_specs=out_spec,
            ),
            compiler_params=cparams,
        )(esmem, x2, m2)

    # Tiny final reduction + normalization in XLA: (n_shards, K, 8, 128) -> (K,)
    pj = 0.5 * acc.sum(axis=(0, 2, 3))               # 0.5 from the tanh identity
    hist = pj / N
    return hist.reshape(1, 1, K)                     # == .unsqueeze(0)


def _reference(x, mu_k, K, L, W, mask=None):
    xf = x.reshape(-1).astype(jnp.float32)
    if mask is not None:
        mf = mask.reshape(-1).astype(jnp.float32)
        N = mf.sum()
    else:
        mf = jnp.ones_like(xf)
        N = jnp.float32(xf.size)
    d = xf[None, :] - jnp.asarray(mu_k, jnp.float32).reshape(K, 1)
    phi = jax.nn.sigmoid((d + L / 2) / W) - jax.nn.sigmoid((d - L / 2) / W)
    pj = (phi * mf[None, :]).sum(axis=1)
    return (pj / N)[None, None, :]


if __name__ == "__main__":
    key = jax.random.PRNGKey(0)

    # K bins covering [0, 1] (typical deep-hist init, uniform spacing == L).
    K = 8
    L = 1.0 / K
    W = L / 2.5
    mu_k = L * (jnp.arange(K, dtype=jnp.float32) + 0.5)

    k1, k2, k3 = jax.random.split(key, 3)

    # 1) Required small example: NCHW (2, 4, 16, 16), no mask (K+1-tanh path).
    x = jax.random.uniform(k1, (2, 4, 16, 16), dtype=jnp.float32)
    out = jax.block_until_ready(single_dim_hist_layer(x, mu_k, K, L, W))
    ref = _reference(x, mu_k, K, L, W)
    assert out.shape == (1, 1, K), out.shape
    assert jnp.allclose(out, ref, atol=1e-4, rtol=1e-4), (out, ref)

    # 2) Masked path (torch.masked_select equivalent via saturating sentinel).
    mask = jax.random.bernoulli(k2, 0.5, (2, 4, 16, 16))
    out_m = jax.block_until_ready(
        single_dim_hist_layer(x, mu_k, K, L, W, mask=mask))
    ref_m = _reference(x, mu_k, K, L, W, mask=mask)
    assert jnp.allclose(out_m, ref_m, atol=1e-4, rtol=1e-4), (out_m, ref_m)

    # 3) Multi-tile path: exercises the grid loop (and megacore split on v7x).
    x3 = jax.random.uniform(k3, (2, 4, 128, 192), dtype=jnp.float32)
    out3 = jax.block_until_ready(single_dim_hist_layer(x3, mu_k, K, L, W))
    ref3 = _reference(x3, mu_k, K, L, W)
    assert jnp.allclose(out3, ref3, atol=1e-4, rtol=1e-4), (out3, ref3)

    # 4) Non-uniform bin centers -> falls back to the 2-tanh-per-bin path.
    mu_nu = mu_k * jnp.linspace(0.8, 1.2, K, dtype=jnp.float32)
    out4 = jax.block_until_ready(single_dim_hist_layer(x, mu_nu, K, L, W))
    ref4 = _reference(x, mu_nu, K, L, W)
    assert jnp.allclose(out4, ref4, atol=1e-4, rtol=1e-4), (out4, ref4)

    print("KERNEL_OK")
</pallas_src>

<mosaic_0001>
module attributes {stable_mosaic.version = 11 : i64} {
  func.func @_hist_kernel_nomask(%arg0: i32, %arg1: i32, %arg2: memref<10xf32, #tpu.memory_space<smem>>, %arg3: memref<64x128xf32, #tpu.memory_space<vmem>>, %arg4: memref<1x8x8x128xf32, #tpu.memory_space<vmem>>) attributes {dimension_semantics = [#tpu.dimension_semantics<parallel>, #tpu.dimension_semantics<arbitrary>], iteration_bounds = array<i64: 1, 1>, scalar_prefetch = 1 : i64, scratch_operands = 0 : i64, tpu.core_type = #tpu.core_type<tc>, window_params = [{transform_indices = @transform_0, window_bounds = array<i64: 64, 128>}, {transform_indices = @transform_1, window_bounds = array<i64: 1, 8, 8, 128>}]} {
    %c0_i32 = arith.constant 0 : i32
    %0 = arith.cmpi eq, %arg1, %c0_i32 : i32
    %1 = arith.extui %0 : i1 to i32
    %c0_i32_0 = arith.constant 0 : i32
    %2 = arith.cmpi ne, %1, %c0_i32_0 : i32
    scf.if %2 {
      %cst_90 = arith.constant 0.000000e+00 : f32
      %460 = vector.broadcast %cst_90 : f32 to vector<1x8x8x128xf32>
      %c0_91 = arith.constant 0 : index
      %c0_92 = arith.constant 0 : index
      %c0_93 = arith.constant 0 : index
      %c0_94 = arith.constant 0 : index
      %461 = vector.load %arg4[%c0_91, %c0_92, %c0_93, %c0_94] : memref<1x8x8x128xf32, #tpu.memory_space<vmem>>, vector<1x8x8x128xf32>
      tpu.vector_store %arg4[%c0_91, %c0_92, %c0_93, %c0_94], %460 {strides = array<i32>} : memref<1x8x8x128xf32, #tpu.memory_space<vmem>>, vector<1x8x8x128xf32>,
    } else {
    }
    %c0 = arith.constant 0 : index
    %3 = memref.load %arg2[%c0] : memref<10xf32, #tpu.memory_space<smem>>
    %c1 = arith.constant 1 : index
    %4 = memref.load %arg2[%c1] : memref<10xf32, #tpu.memory_space<smem>>
    %c2 = arith.constant 2 : index
    %5 = memref.load %arg2[%c2] : memref<10xf32, #tpu.memory_space<smem>>
    %c3 = arith.constant 3 : index
    %6 = memref.load %arg2[%c3] : memref<10xf32, #tpu.memory_space<smem>>
    %c4 = arith.constant 4 : index
    %7 = memref.load %arg2[%c4] : memref<10xf32, #tpu.memory_space<smem>>
    %c5 = arith.constant 5 : index
    %8 = memref.load %arg2[%c5] : memref<10xf32, #tpu.memory_space<smem>>
    %c6 = arith.constant 6 : index
    %9 = memref.load %arg2[%c6] : memref<10xf32, #tpu.memory_space<smem>>
    %c7 = arith.constant 7 : index
    %10 = memref.load %arg2[%c7] : memref<10xf32, #tpu.memory_space<smem>>
    %c8 = arith.constant 8 : index
    %11 = memref.load %arg2[%c8] : memref<10xf32, #tpu.memory_space<smem>>
    %cst = arith.constant 0.000000e+00 : f32
    %12 = vector.broadcast %cst : f32 to vector<8x128xf32>
    %cst_1 = arith.constant 0.000000e+00 : f32
    %13 = vector.broadcast %cst_1 : f32 to vector<8x128xf32>
    %cst_2 = arith.constant 0.000000e+00 : f32
    %14 = vector.broadcast %cst_2 : f32 to vector<8x128xf32>
    %cst_3 = arith.constant 0.000000e+00 : f32
    %15 = vector.broadcast %cst_3 : f32 to vector<8x128xf32>
    %cst_4 = arith.constant 0.000000e+00 : f32
    %16 = vector.broadcast %cst_4 : f32 to vector<8x128xf32>
    %cst_5 = arith.constant 0.000000e+00 : f32
    %17 = vector.broadcast %cst_5 : f32 to vector<8x128xf32>
    %cst_6 = arith.constant 0.000000e+00 : f32
    %18 = vector.broadcast %cst_6 : f32 to vector<8x128xf32>
    %cst_7 = arith.constant 0.000000e+00 : f32
    %19 = vector.broadcast %cst_7 : f32 to vector<8x128xf32>
    %cst_8 = arith.constant 1.000000e+01 : f32
    %c0_i32_9 = arith.constant 0 : i32
    %c8_i32 = arith.constant 8 : i32
    %20 = arith.muli %c0_i32_9, %c8_i32 : i32
    %21 = tpu.assume_multiple %20, 8 : i32
    %22 = arith.index_cast %21 : i32 to index
    %c0_10 = arith.constant 0 : index
    %23 = vector.load %arg3[%22, %c0_10] : memref<64x128xf32, #tpu.memory_space<vmem>>, vector<8x128xf32>
    %24 = vector.broadcast %cst_8 : f32 to vector<8x128xf32>
    %25 = arith.mulf %23, %24 : vector<8x128xf32>
    %26 = vector.broadcast %3 : f32 to vector<8x128xf32>
    %27 = arith.addf %25, %26 : vector<8x128xf32>
    %28 = math.tanh %27 : vector<8x128xf32>
    %29 = vector.broadcast %4 : f32 to vector<8x128xf32>
    %30 = arith.addf %25, %29 : vector<8x128xf32>
    %31 = math.tanh %30 : vector<8x128xf32>
    %32 = arith.subf %28, %31 : vector<8x128xf32>
    %33 = arith.addf %12, %32 : vector<8x128xf32>
    %34 = vector.broadcast %5 : f32 to vector<8x128xf32>
    %35 = arith.addf %25, %34 : vector<8x128xf32>
    %36 = math.tanh %35 : vector<8x128xf32>
    %37 = arith.subf %31, %36 : vector<8x128xf32>
    %38 = arith.addf %13, %37 : vector<8x128xf32>
    %39 = vector.broadcast %6 : f32 to vector<8x128xf32>
    %40 = arith.addf %25, %39 : vector<8x128xf32>
    %41 = math.tanh %40 : vector<8x128xf32>
    %42 = arith.subf %36, %41 : vector<8x128xf32>
    %43 = arith.addf %14, %42 : vector<8x128xf32>
    %44 = vector.broadcast %7 : f32 to vector<8x128xf32>
    %45 = arith.addf %25, %44 : vector<8x128xf32>
    %46 = math.tanh %45 : vector<8x128xf32>
    %47 = arith.subf %41, %46 : vector<8x128xf32>
    %48 = arith.addf %15, %47 : vector<8x128xf32>
    %49 = vector.broadcast %8 : f32 to vector<8x128xf32>
    %50 = arith.addf %25, %49 : vector<8x128xf32>
    %51 = math.tanh %50 : vector<8x128xf32>
    %52 = arith.subf %46, %51 : vector<8x128xf32>
    %53 = arith.addf %16, %52 : vector<8x128xf32>
    %54 = vector.broadcast %9 : f32 to vector<8x128xf32>
    %55 = arith.addf %25, %54 : vector<8x128xf32>
    %56 = math.tanh %55 : vector<8x128xf32>
    %57 = arith.subf %51, %56 : vector<8x128xf32>
    %58 = arith.addf %17, %57 : vector<8x128xf32>
    %59 = vector.broadcast %10 : f32 to vector<8x128xf32>
    %60 = arith.addf %25, %59 : vector<8x128xf32>
    %61 = math.tanh %60 : vector<8x128xf32>
    %62 = arith.subf %56, %61 : vector<8x128xf32>
    %63 = arith.addf %18, %62 : vector<8x128xf32>
    %64 = vector.broadcast %11 : f32 to vector<8x128xf32>
    %65 = arith.addf %25, %64 : vector<8x128xf32>
    %66 = math.tanh %65 : vector<8x128xf32>
    %67 = arith.subf %61, %66 : vector<8x128xf32>
    %68 = arith.addf %19, %67 : vector<8x128xf32>
    %c1_i32 = arith.constant 1 : i32
    %c8_i32_11 = arith.constant 8 : i32
    %69 = arith.muli %c1_i32, %c8_i32_11 : i32
    %70 = tpu.assume_multiple %69, 8 : i32
    %71 = arith.index_cast %70 : i32 to index
    %c0_12 = arith.constant 0 : index
    %72 = vector.load %arg3[%71, %c0_12] : memref<64x128xf32, #tpu.memory_space<vmem>>, vector<8x128xf32>
    %73 = vector.broadcast %cst_8 : f32 to vector<8x128xf32>
    %74 = arith.mulf %72, %73 : vector<8x128xf32>
    %75 = vector.broadcast %3 : f32 to vector<8x128xf32>
    %76 = arith.addf %74, %75 : vector<8x128xf32>
    %77 = math.tanh %76 : vector<8x128xf32>
    %78 = vector.broadcast %4 : f32 to vector<8x128xf32>
    %79 = arith.addf %74, %78 : vector<8x128xf32>
    %80 = math.tanh %79 : vector<8x128xf32>
    %81 = arith.subf %77, %80 : vector<8x128xf32>
    %82 = arith.addf %33, %81 : vector<8x128xf32>
    %83 = vector.broadcast %5 : f32 to vector<8x128xf32>
    %84 = arith.addf %74, %83 : vector<8x128xf32>
    %85 = math.tanh %84 : vector<8x128xf32>
    %86 = arith.subf %80, %85 : vector<8x128xf32>
    %87 = arith.addf %38, %86 : vector<8x128xf32>
    %88 = vector.broadcast %6 : f32 to vector<8x128xf32>
    %89 = arith.addf %74, %88 : vector<8x128xf32>
    %90 = math.tanh %89 : vector<8x128xf32>
    %91 = arith.subf %85, %90 : vector<8x128xf32>
    %92 = arith.addf %43, %91 : vector<8x128xf32>
    %93 = vector.broadcast %7 : f32 to vector<8x128xf32>
    %94 = arith.addf %74, %93 : vector<8x128xf32>
    %95 = math.tanh %94 : vector<8x128xf32>
    %96 = arith.subf %90, %95 : vector<8x128xf32>
    %97 = arith.addf %48, %96 : vector<8x128xf32>
    %98 = vector.broadcast %8 : f32 to vector<8x128xf32>
    %99 = arith.addf %74, %98 : vector<8x128xf32>
    %100 = math.tanh %99 : vector<8x128xf32>
    %101 = arith.subf %95, %100 : vector<8x128xf32>
    %102 = arith.addf %53, %101 : vector<8x128xf32>
    %103 = vector.broadcast %9 : f32 to vector<8x128xf32>
    %104 = arith.addf %74, %103 : vector<8x128xf32>
    %105 = math.tanh %104 : vector<8x128xf32>
    %106 = arith.subf %100, %105 : vector<8x128xf32>
    %107 = arith.addf %58, %106 : vector<8x128xf32>
    %108 = vector.broadcast %10 : f32 to vector<8x128xf32>
    %109 = arith.addf %74, %108 : vector<8x128xf32>
    %110 = math.tanh %109 : vector<8x128xf32>
    %111 = arith.subf %105, %110 : vector<8x128xf32>
    %112 = arith.addf %63, %111 : vector<8x128xf32>
    %113 = vector.broadcast %11 : f32 to vector<8x128xf32>
    %114 = arith.addf %74, %113 : vector<8x128xf32>
    %115 = math.tanh %114 : vector<8x128xf32>
    %116 = arith.subf %110, %115 : vector<8x128xf32>
    %117 = arith.addf %68, %116 : vector<8x128xf32>
    %c2_i32 = arith.constant 2 : i32
    %c8_i32_13 = arith.constant 8 : i32
    %118 = arith.muli %c2_i32, %c8_i32_13 : i32
    %119 = tpu.assume_multiple %118, 8 : i32
    %120 = arith.index_cast %119 : i32 to index
    %c0_14 = arith.constant 0 : index
    %121 = vector.load %arg3[%120, %c0_14] : memref<64x128xf32, #tpu.memory_space<vmem>>, vector<8x128xf32>
    %122 = vector.broadcast %cst_8 : f32 to vector<8x128xf32>
    %123 = arith.mulf %121, %122 : vector<8x128xf32>
    %124 = vector.broadcast %3 : f32 to vector<8x128xf32>
    %125 = arith.addf %123, %124 : vector<8x128xf32>
    %126 = math.tanh %125 : vector<8x128xf32>
    %127 = vector.broadcast %4 : f32 to vector<8x128xf32>
    %128 = arith.addf %123, %127 : vector<8x128xf32>
    %129 = math.tanh %128 : vector<8x128xf32>
    %130 = arith.subf %126, %129 : vector<8x128xf32>
    %131 = arith.addf %82, %130 : vector<8x128xf32>
    %132 = vector.broadcast %5 : f32 to vector<8x128xf32>
    %133 = arith.addf %123, %132 : vector<8x128xf32>
    %134 = math.tanh %133 : vector<8x128xf32>
    %135 = arith.subf %129, %134 : vector<8x128xf32>
    %136 = arith.addf %87, %135 : vector<8x128xf32>
    %137 = vector.broadcast %6 : f32 to vector<8x128xf32>
    %138 = arith.addf %123, %137 : vector<8x128xf32>
    %139 = math.tanh %138 : vector<8x128xf32>
    %140 = arith.subf %134, %139 : vector<8x128xf32>
    %141 = arith.addf %92, %140 : vector<8x128xf32>
    %142 = vector.broadcast %7 : f32 to vector<8x128xf32>
    %143 = arith.addf %123, %142 : vector<8x128xf32>
    %144 = math.tanh %143 : vector<8x128xf32>
    %145 = arith.subf %139, %144 : vector<8x128xf32>
    %146 = arith.addf %97, %145 : vector<8x128xf32>
    %147 = vector.broadcast %8 : f32 to vector<8x128xf32>
    %148 = arith.addf %123, %147 : vector<8x128xf32>
    %149 = math.tanh %148 : vector<8x128xf32>
    %150 = arith.subf %144, %149 : vector<8x128xf32>
    %151 = arith.addf %102, %150 : vector<8x128xf32>
    %152 = vector.broadcast %9 : f32 to vector<8x128xf32>
    %153 = arith.addf %123, %152 : vector<8x128xf32>
    %154 = math.tanh %153 : vector<8x128xf32>
    %155 = arith.subf %149, %154 : vector<8x128xf32>
    %156 = arith.addf %107, %155 : vector<8x128xf32>
    %157 = vector.broadcast %10 : f32 to vector<8x128xf32>
    %158 = arith.addf %123, %157 : vector<8x128xf32>
    %159 = math.tanh %158 : vector<8x128xf32>
    %160 = arith.subf %154, %159 : vector<8x128xf32>
    %161 = arith.addf %112, %160 : vector<8x128xf32>
    %162 = vector.broadcast %11 : f32 to vector<8x128xf32>
    %163 = arith.addf %123, %162 : vector<8x128xf32>
    %164 = math.tanh %163 : vector<8x128xf32>
    %165 = arith.subf %159, %164 : vector<8x128xf32>
    %166 = arith.addf %117, %165 : vector<8x128xf32>
    %c3_i32 = arith.constant 3 : i32
    %c8_i32_15 = arith.constant 8 : i32
    %167 = arith.muli %c3_i32, %c8_i32_15 : i32
    %168 = tpu.assume_multiple %167, 8 : i32
    %169 = arith.index_cast %168 : i32 to index
    %c0_16 = arith.constant 0 : index
    %170 = vector.load %arg3[%169, %c0_16] : memref<64x128xf32, #tpu.memory_space<vmem>>, vector<8x128xf32>
    %171 = vector.broadcast %cst_8 : f32 to vector<8x128xf32>
    %172 = arith.mulf %170, %171 : vector<8x128xf32>
    %173 = vector.broadcast %3 : f32 to vector<8x128xf32>
    %174 = arith.addf %172, %173 : vector<8x128xf32>
    %175 = math.tanh %174 : vector<8x128xf32>
    %176 = vector.broadcast %4 : f32 to vector<8x128xf32>
    %177 = arith.addf %172, %176 : vector<8x128xf32>
    %178 = math.tanh %177 : vector<8x128xf32>
    %179 = arith.subf %175, %178 : vector<8x128xf32>
    %180 = arith.addf %131, %179 : vector<8x128xf32>
    %181 = vector.broadcast %5 : f32 to vector<8x128xf32>
    %182 = arith.addf %172, %181 : vector<8x128xf32>
    %183 = math.tanh %182 : vector<8x128xf32>
    %184 = arith.subf %178, %183 : vector<8x128xf32>
    %185 = arith.addf %136, %184 : vector<8x128xf32>
    %186 = vector.broadcast %6 : f32 to vector<8x128xf32>
    %187 = arith.addf %172, %186 : vector<8x128xf32>
    %188 = math.tanh %187 : vector<8x128xf32>
    %189 = arith.subf %183, %188 : vector<8x128xf32>
    %190 = arith.addf %141, %189 : vector<8x128xf32>
    %191 = vector.broadcast %7 : f32 to vector<8x128xf32>
    %192 = arith.addf %172, %191 : vector<8x128xf32>
    %193 = math.tanh %192 : vector<8x128xf32>
    %194 = arith.subf %188, %193 : vector<8x128xf32>
    %195 = arith.addf %146, %194 : vector<8x128xf32>
    %196 = vector.broadcast %8 : f32 to vector<8x128xf32>
    %197 = arith.addf %172, %196 : vector<8x128xf32>
    %198 = math.tanh %197 : vector<8x128xf32>
    %199 = arith.subf %193, %198 : vector<8x128xf32>
    %200 = arith.addf %151, %199 : vector<8x128xf32>
    %201 = vector.broadcast %9 : f32 to vector<8x128xf32>
    %202 = arith.addf %172, %201 : vector<8x128xf32>
    %203 = math.tanh %202 : vector<8x128xf32>
    %204 = arith.subf %198, %203 : vector<8x128xf32>
    %205 = arith.addf %156, %204 : vector<8x128xf32>
    %206 = vector.broadcast %10 : f32 to vector<8x128xf32>
    %207 = arith.addf %172, %206 : vector<8x128xf32>
    %208 = math.tanh %207 : vector<8x128xf32>
    %209 = arith.subf %203, %208 : vector<8x128xf32>
    %210 = arith.addf %161, %209 : vector<8x128xf32>
    %211 = vector.broadcast %11 : f32 to vector<8x128xf32>
    %212 = arith.addf %172, %211 : vector<8x128xf32>
    %213 = math.tanh %212 : vector<8x128xf32>
    %214 = arith.subf %208, %213 : vector<8x128xf32>
    %215 = arith.addf %166, %214 : vector<8x128xf32>
    %c4_i32 = arith.constant 4 : i32
    %c8_i32_17 = arith.constant 8 : i32
    %216 = arith.muli %c4_i32, %c8_i32_17 : i32
    %217 = tpu.assume_multiple %216, 8 : i32
    %218 = arith.index_cast %217 : i32 to index
    %c0_18 = arith.constant 0 : index
    %219 = vector.load %arg3[%218, %c0_18] : memref<64x128xf32, #tpu.memory_space<vmem>>, vector<8x128xf32>
    %220 = vector.broadcast %cst_8 : f32 to vector<8x128xf32>
    %221 = arith.mulf %219, %220 : vector<8x128xf32>
    %222 = vector.broadcast %3 : f32 to vector<8x128xf32>
    %223 = arith.addf %221, %222 : vector<8x128xf32>
    %224 = math.tanh %223 : vector<8x128xf32>
    %225 = vector.broadcast %4 : f32 to vector<8x128xf32>
    %226 = arith.addf %221, %225 : vector<8x128xf32>
    %227 = math.tanh %226 : vector<8x128xf32>
    %228 = arith.subf %224, %227 : vector<8x128xf32>
    %229 = arith.addf %180, %228 : vector<8x128xf32>
    %230 = vector.broadcast %5 : f32 to vector<8x128xf32>
    %231 = arith.addf %221, %230 : vector<8x128xf32>
    %232 = math.tanh %231 : vector<8x128xf32>
    %233 = arith.subf %227, %232 : vector<8x128xf32>
    %234 = arith.addf %185, %233 : vector<8x128xf32>
    %235 = vector.broadcast %6 : f32 to vector<8x128xf32>
    %236 = arith.addf %221, %235 : vector<8x128xf32>
    %237 = math.tanh %236 : vector<8x128xf32>
    %238 = arith.subf %232, %237 : vector<8x128xf32>
    %239 = arith.addf %190, %238 : vector<8x128xf32>
    %240 = vector.broadcast %7 : f32 to vector<8x128xf32>
    %241 = arith.addf %221, %240 : vector<8x128xf32>
    %242 = math.tanh %241 : vector<8x128xf32>
    %243 = arith.subf %237, %242 : vector<8x128xf32>
    %244 = arith.addf %195, %243 : vector<8x128xf32>
    %245 = vector.broadcast %8 : f32 to vector<8x128xf32>
    %246 = arith.addf %221, %245 : vector<8x128xf32>
    %247 = math.tanh %246 : vector<8x128xf32>
    %248 = arith.subf %242, %247 : vector<8x128xf32>
    %249 = arith.addf %200, %248 : vector<8x128xf32>
    %250 = vector.broadcast %9 : f32 to vector<8x128xf32>
    %251 = arith.addf %221, %250 : vector<8x128xf32>
    %252 = math.tanh %251 : vector<8x128xf32>
    %253 = arith.subf %247, %252 : vector<8x128xf32>
    %254 = arith.addf %205, %253 : vector<8x128xf32>
    %255 = vector.broadcast %10 : f32 to vector<8x128xf32>
    %256 = arith.addf %221, %255 : vector<8x128xf32>
    %257 = math.tanh %256 : vector<8x128xf32>
    %258 = arith.subf %252, %257 : vector<8x128xf32>
    %259 = arith.addf %210, %258 : vector<8x128xf32>
    %260 = vector.broadcast %11 : f32 to vector<8x128xf32>
    %261 = arith.addf %221, %260 : vector<8x128xf32>
    %262 = math.tanh %261 : vector<8x128xf32>
    %263 = arith.subf %257, %262 : vector<8x128xf32>
    %264 = arith.addf %215, %263 : vector<8x128xf32>
    %c5_i32 = arith.constant 5 : i32
    %c8_i32_19 = arith.constant 8 : i32
    %265 = arith.muli %c5_i32, %c8_i32_19 : i32
    %266 = tpu.assume_multiple %265, 8 : i32
    %267 = arith.index_cast %266 : i32 to index
    %c0_20 = arith.constant 0 : index
    %268 = vector.load %arg3[%267, %c0_20] : memref<64x128xf32, #tpu.memory_space<vmem>>, vector<8x128xf32>
    %269 = vector.broadcast %cst_8 : f32 to vector<8x128xf32>
    %270 = arith.mulf %268, %269 : vector<8x128xf32>
    %271 = vector.broadcast %3 : f32 to vector<8x128xf32>
    %272 = arith.addf %270, %271 : vector<8x128xf32>
    %273 = math.tanh %272 : vector<8x128xf32>
    %274 = vector.broadcast %4 : f32 to vector<8x128xf32>
    %275 = arith.addf %270, %274 : vector<8x128xf32>
    %276 = math.tanh %275 : vector<8x128xf32>
    %277 = arith.subf %273, %276 : vector<8x128xf32>
    %278 = arith.addf %229, %277 : vector<8x128xf32>
    %279 = vector.broadcast %5 : f32 to vector<8x128xf32>
    %280 = arith.addf %270, %279 : vector<8x128xf32>
    %281 = math.tanh %280 : vector<8x128xf32>
    %282 = arith.subf %276, %281 : vector<8x128xf32>
    %283 = arith.addf %234, %282 : vector<8x128xf32>
    %284 = vector.broadcast %6 : f32 to vector<8x128xf32>
    %285 = arith.addf %270, %284 : vector<8x128xf32>
    %286 = math.tanh %285 : vector<8x128xf32>
    %287 = arith.subf %281, %286 : vector<8x128xf32>
    %288 = arith.addf %239, %287 : vector<8x128xf32>
    %289 = vector.broadcast %7 : f32 to vector<8x128xf32>
    %290 = arith.addf %270, %289 : vector<8x128xf32>
    %291 = math.tanh %290 : vector<8x128xf32>
    %292 = arith.subf %286, %291 : vector<8x128xf32>
    %293 = arith.addf %244, %292 : vector<8x128xf32>
    %294 = vector.broadcast %8 : f32 to vector<8x128xf32>
    %295 = arith.addf %270, %294 : vector<8x128xf32>
    %296 = math.tanh %295 : vector<8x128xf32>
    %297 = arith.subf %291, %296 : vector<8x128xf32>
    %298 = arith.addf %249, %297 : vector<8x128xf32>
    %299 = vector.broadcast %9 : f32 to vector<8x128xf32>
    %300 = arith.addf %270, %299 : vector<8x128xf32>
    %301 = math.tanh %300 : vector<8x128xf32>
    %302 = arith.subf %296, %301 : vector<8x128xf32>
    %303 = arith.addf %254, %302 : vector<8x128xf32>
    %304 = vector.broadcast %10 : f32 to vector<8x128xf32>
    %305 = arith.addf %270, %304 : vector<8x128xf32>
    %306 = math.tanh %305 : vector<8x128xf32>
    %307 = arith.subf %301, %306 : vector<8x128xf32>
    %308 = arith.addf %259, %307 : vector<8x128xf32>
    %309 = vector.broadcast %11 : f32 to vector<8x128xf32>
    %310 = arith.addf %270, %309 : vector<8x128xf32>
    %311 = math.tanh %310 : vector<8x128xf32>
    %312 = arith.subf %306, %311 : vector<8x128xf32>
    %313 = arith.addf %264, %312 : vector<8x128xf32>
    %c6_i32 = arith.constant 6 : i32
    %c8_i32_21 = arith.constant 8 : i32
    %314 = arith.muli %c6_i32, %c8_i32_21 : i32
    %315 = tpu.assume_multiple %314, 8 : i32
    %316 = arith.index_cast %315 : i32 to index
    %c0_22 = arith.constant 0 : index
    %317 = vector.load %arg3[%316, %c0_22] : memref<64x128xf32, #tpu.memory_space<vmem>>, vector<8x128xf32>
    %318 = vector.broadcast %cst_8 : f32 to vector<8x128xf32>
    %319 = arith.mulf %317, %318 : vector<8x128xf32>
    %320 = vector.broadcast %3 : f32 to vector<8x128xf32>
    %321 = arith.addf %319, %320 : vector<8x128xf32>
    %322 = math.tanh %321 : vector<8x128xf32>
    %323 = vector.broadcast %4 : f32 to vector<8x128xf32>
    %324 = arith.addf %319, %323 : vector<8x128xf32>
    %325 = math.tanh %324 : vector<8x128xf32>
    %326 = arith.subf %322, %325 : vector<8x128xf32>
    %327 = arith.addf %278, %326 : vector<8x128xf32>
    %328 = vector.broadcast %5 : f32 to vector<8x128xf32>
    %329 = arith.addf %319, %328 : vector<8x128xf32>
    %330 = math.tanh %329 : vector<8x128xf32>
    %331 = arith.subf %325, %330 : vector<8x128xf32>
    %332 = arith.addf %283, %331 : vector<8x128xf32>
    %333 = vector.broadcast %6 : f32 to vector<8x128xf32>
    %334 = arith.addf %319, %333 : vector<8x128xf32>
    %335 = math.tanh %334 : vector<8x128xf32>
    %336 = arith.subf %330, %335 : vector<8x128xf32>
    %337 = arith.addf %288, %336 : vector<8x128xf32>
    %338 = vector.broadcast %7 : f32 to vector<8x128xf32>
    %339 = arith.addf %319, %338 : vector<8x128xf32>
    %340 = math.tanh %339 : vector<8x128xf32>
    %341 = arith.subf %335, %340 : vector<8x128xf32>
    %342 = arith.addf %293, %341 : vector<8x128xf32>
    %343 = vector.broadcast %8 : f32 to vector<8x128xf32>
    %344 = arith.addf %319, %343 : vector<8x128xf32>
    %345 = math.tanh %344 : vector<8x128xf32>
    %346 = arith.subf %340, %345 : vector<8x128xf32>
    %347 = arith.addf %298, %346 : vector<8x128xf32>
    %348 = vector.broadcast %9 : f32 to vector<8x128xf32>
    %349 = arith.addf %319, %348 : vector<8x128xf32>
    %350 = math.tanh %349 : vector<8x128xf32>
    %351 = arith.subf %345, %350 : vector<8x128xf32>
    %352 = arith.addf %303, %351 : vector<8x128xf32>
    %353 = vector.broadcast %10 : f32 to vector<8x128xf32>
    %354 = arith.addf %319, %353 : vector<8x128xf32>
    %355 = math.tanh %354 : vector<8x128xf32>
    %356 = arith.subf %350, %355 : vector<8x128xf32>
    %357 = arith.addf %308, %356 : vector<8x128xf32>
    %358 = vector.broadcast %11 : f32 to vector<8x128xf32>
    %359 = arith.addf %319, %358 : vector<8x128xf32>
    %360 = math.tanh %359 : vector<8x128xf32>
    %361 = arith.subf %355, %360 : vector<8x128xf32>
    %362 = arith.addf %313, %361 : vector<8x128xf32>
    %c7_i32 = arith.constant 7 : i32
    %c8_i32_23 = arith.constant 8 : i32
    %363 = arith.muli %c7_i32, %c8_i32_23 : i32
    %364 = tpu.assume_multiple %363, 8 : i32
    %365 = arith.index_cast %364 : i32 to index
    %c0_24 = arith.constant 0 : index
    %366 = vector.load %arg3[%365, %c0_24] : memref<64x128xf32, #tpu.memory_space<vmem>>, vector<8x128xf32>
    %367 = vector.broadcast %cst_8 : f32 to vector<8x128xf32>
    %368 = arith.mulf %366, %367 : vector<8x128xf32>
    %369 = vector.broadcast %3 : f32 to vector<8x128xf32>
    %370 = arith.addf %368, %369 : vector<8x128xf32>
    %371 = math.tanh %370 : vector<8x128xf32>
    %372 = vector.broadcast %4 : f32 to vector<8x128xf32>
    %373 = arith.addf %368, %372 : vector<8x128xf32>
    %374 = math.tanh %373 : vector<8x128xf32>
    %375 = arith.subf %371, %374 : vector<8x128xf32>
    %376 = arith.addf %327, %375 : vector<8x128xf32>
    %377 = vector.broadcast %5 : f32 to vector<8x128xf32>
    %378 = arith.addf %368, %377 : vector<8x128xf32>
    %379 = math.tanh %378 : vector<8x128xf32>
    %380 = arith.subf %374, %379 : vector<8x128xf32>
    %381 = arith.addf %332, %380 : vector<8x128xf32>
    %382 = vector.broadcast %6 : f32 to vector<8x128xf32>
    %383 = arith.addf %368, %382 : vector<8x128xf32>
    %384 = math.tanh %383 : vector<8x128xf32>
    %385 = arith.subf %379, %384 : vector<8x128xf32>
    %386 = arith.addf %337, %385 : vector<8x128xf32>
    %387 = vector.broadcast %7 : f32 to vector<8x128xf32>
    %388 = arith.addf %368, %387 : vector<8x128xf32>
    %389 = math.tanh %388 : vector<8x128xf32>
    %390 = arith.subf %384, %389 : vector<8x128xf32>
    %391 = arith.addf %342, %390 : vector<8x128xf32>
    %392 = vector.broadcast %8 : f32 to vector<8x128xf32>
    %393 = arith.addf %368, %392 : vector<8x128xf32>
    %394 = math.tanh %393 : vector<8x128xf32>
    %395 = arith.subf %389, %394 : vector<8x128xf32>
    %396 = arith.addf %347, %395 : vector<8x128xf32>
    %397 = vector.broadcast %9 : f32 to vector<8x128xf32>
    %398 = arith.addf %368, %397 : vector<8x128xf32>
    %399 = math.tanh %398 : vector<8x128xf32>
    %400 = arith.subf %394, %399 : vector<8x128xf32>
    %401 = arith.addf %352, %400 : vector<8x128xf32>
    %402 = vector.broadcast %10 : f32 to vector<8x128xf32>
    %403 = arith.addf %368, %402 : vector<8x128xf32>
    %404 = math.tanh %403 : vector<8x128xf32>
    %405 = arith.subf %399, %404 : vector<8x128xf32>
    %406 = arith.addf %357, %405 : vector<8x128xf32>
    %407 = vector.broadcast %11 : f32 to vector<8x128xf32>
    %408 = arith.addf %368, %407 : vector<8x128xf32>
    %409 = math.tanh %408 : vector<8x128xf32>
    %410 = arith.subf %404, %409 : vector<8x128xf32>
    %411 = arith.addf %362, %410 : vector<8x128xf32>
    %c8_i32_25 = arith.constant 8 : i32
    %c0_26 = arith.constant 0 : index
    %c0_27 = arith.constant 0 : index
    %c0_28 = arith.constant 0 : index
    %c0_29 = arith.constant 0 : index
    %412 = vector.load %arg4[%c0_26, %c0_27, %c0_28, %c0_29] : memref<1x8x8x128xf32, #tpu.memory_space<vmem>>, vector<1x1x8x128xf32>
    %413 = vector.shape_cast %412 : vector<1x1x8x128xf32> to vector<8x128xf32>
    %414 = arith.addf %413, %376 : vector<8x128xf32>
    %c0_30 = arith.constant 0 : index
    %c0_31 = arith.constant 0 : index
    %c0_32 = arith.constant 0 : index
    %c0_33 = arith.constant 0 : index
    %415 = vector.load %arg4[%c0_30, %c0_31, %c0_32, %c0_33] : memref<1x8x8x128xf32, #tpu.memory_space<vmem>>, vector<1x1x8x128xf32>
    %416 = vector.shape_cast %415 : vector<1x1x8x128xf32> to vector<8x128xf32>
    %417 = vector.shape_cast %414 : vector<8x128xf32> to vector<1x1x8x128xf32>
    tpu.vector_store %arg4[%c0_30, %c0_31, %c0_32, %c0_33], %417 {strides = array<i32>} : memref<1x8x8x128xf32, #tpu.memory_space<vmem>>, vector<1x1x8x128xf32>,
    %c0_34 = arith.constant 0 : index
    %c1_35 = arith.constant 1 : index
    %c0_36 = arith.constant 0 : index
    %c0_37 = arith.constant 0 : index
    %418 = vector.load %arg4[%c0_34, %c1_35, %c0_36, %c0_37] : memref<1x8x8x128xf32, #tpu.memory_space<vmem>>, vector<1x1x8x128xf32>
    %419 = vector.shape_cast %418 : vector<1x1x8x128xf32> to vector<8x128xf32>
    %420 = arith.addf %419, %381 : vector<8x128xf32>
    %c0_38 = arith.constant 0 : index
    %c1_39 = arith.constant 1 : index
    %c0_40 = arith.constant 0 : index
    %c0_41 = arith.constant 0 : index
    %421 = vector.load %arg4[%c0_38, %c1_39, %c0_40, %c0_41] : memref<1x8x8x128xf32, #tpu.memory_space<vmem>>, vector<1x1x8x128xf32>
    %422 = vector.shape_cast %421 : vector<1x1x8x128xf32> to vector<8x128xf32>
    %423 = vector.shape_cast %420 : vector<8x128xf32> to vector<1x1x8x128xf32>
    tpu.vector_store %arg4[%c0_38, %c1_39, %c0_40, %c0_41], %423 {strides = array<i32>} : memref<1x8x8x128xf32, #tpu.memory_space<vmem>>, vector<1x1x8x128xf32>,
    %c0_42 = arith.constant 0 : index
    %c2_43 = arith.constant 2 : index
    %c0_44 = arith.constant 0 : index
    %c0_45 = arith.constant 0 : index
    %424 = vector.load %arg4[%c0_42, %c2_43, %c0_44, %c0_45] : memref<1x8x8x128xf32, #tpu.memory_space<vmem>>, vector<1x1x8x128xf32>
    %425 = vector.shape_cast %424 : vector<1x1x8x128xf32> to vector<8x128xf32>
    %426 = arith.addf %425, %386 : vector<8x128xf32>
    %c0_46 = arith.constant 0 : index
    %c2_47 = arith.constant 2 : index
    %c0_48 = arith.constant 0 : index
    %c0_49 = arith.constant 0 : index
    %427 = vector.load %arg4[%c0_46, %c2_47, %c0_48, %c0_49] : memref<1x8x8x128xf32, #tpu.memory_space<vmem>>, vector<1x1x8x128xf32>
    %428 = vector.shape_cast %427 : vector<1x1x8x128xf32> to vector<8x128xf32>
    %429 = vector.shape_cast %426 : vector<8x128xf32> to vector<1x1x8x128xf32>
    tpu.vector_store %arg4[%c0_46, %c2_47, %c0_48, %c0_49], %429 {strides = array<i32>} : memref<1x8x8x128xf32, #tpu.memory_space<vmem>>, vector<1x1x8x128xf32>,
    %c0_50 = arith.constant 0 : index
    %c3_51 = arith.constant 3 : index
    %c0_52 = arith.constant 0 : index
    %c0_53 = arith.constant 0 : index
    %430 = vector.load %arg4[%c0_50, %c3_51, %c0_52, %c0_53] : memref<1x8x8x128xf32, #tpu.memory_space<vmem>>, vector<1x1x8x128xf32>
    %431 = vector.shape_cast %430 : vector<1x1x8x128xf32> to vector<8x128xf32>
    %432 = arith.addf %431, %391 : vector<8x128xf32>
    %c0_54 = arith.constant 0 : index
    %c3_55 = arith.constant 3 : index
    %c0_56 = arith.constant 0 : index
    %c0_57 = arith.constant 0 : index
    %433 = vector.load %arg4[%c0_54, %c3_55, %c0_56, %c0_57] : memref<1x8x8x128xf32, #tpu.memory_space<vmem>>, vector<1x1x8x128xf32>
    %434 = vector.shape_cast %433 : vector<1x1x8x128xf32> to vector<8x128xf32>
    %435 = vector.shape_cast %432 : vector<8x128xf32> to vector<1x1x8x128xf32>
    tpu.vector_store %arg4[%c0_54, %c3_55, %c0_56, %c0_57], %435 {strides = array<i32>} : memref<1x8x8x128xf32, #tpu.memory_space<vmem>>, vector<1x1x8x128xf32>,
    %c0_58 = arith.constant 0 : index
    %c4_59 = arith.constant 4 : index
    %c0_60 = arith.constant 0 : index
    %c0_61 = arith.constant 0 : index
    %436 = vector.load %arg4[%c0_58, %c4_59, %c0_60, %c0_61] : memref<1x8x8x128xf32, #tpu.memory_space<vmem>>, vector<1x1x8x128xf32>
    %437 = vector.shape_cast %436 : vector<1x1x8x128xf32> to vector<8x128xf32>
    %438 = arith.addf %437, %396 : vector<8x128xf32>
    %c0_62 = arith.constant 0 : index
    %c4_63 = arith.constant 4 : index
    %c0_64 = arith.constant 0 : index
    %c0_65 = arith.constant 0 : index
    %439 = vector.load %arg4[%c0_62, %c4_63, %c0_64, %c0_65] : memref<1x8x8x128xf32, #tpu.memory_space<vmem>>, vector<1x1x8x128xf32>
    %440 = vector.shape_cast %439 : vector<1x1x8x128xf32> to vector<8x128xf32>
    %441 = vector.shape_cast %438 : vector<8x128xf32> to vector<1x1x8x128xf32>
    tpu.vector_store %arg4[%c0_62, %c4_63, %c0_64, %c0_65], %441 {strides = array<i32>} : memref<1x8x8x128xf32, #tpu.memory_space<vmem>>, vector<1x1x8x128xf32>,
    %c0_66 = arith.constant 0 : index
    %c5_67 = arith.constant 5 : index
    %c0_68 = arith.constant 0 : index
    %c0_69 = arith.constant 0 : index
    %442 = vector.load %arg4[%c0_66, %c5_67, %c0_68, %c0_69] : memref<1x8x8x128xf32, #tpu.memory_space<vmem>>, vector<1x1x8x128xf32>
    %443 = vector.shape_cast %442 : vector<1x1x8x128xf32> to vector<8x128xf32>
    %444 = arith.addf %443, %401 : vector<8x128xf32>
    %c0_70 = arith.constant 0 : index
    %c5_71 = arith.constant 5 : index
    %c0_72 = arith.constant 0 : index
    %c0_73 = arith.constant 0 : index
    %445 = vector.load %arg4[%c0_70, %c5_71, %c0_72, %c0_73] : memref<1x8x8x128xf32, #tpu.memory_space<vmem>>, vector<1x1x8x128xf32>
    %446 = vector.shape_cast %445 : vector<1x1x8x128xf32> to vector<8x128xf32>
    %447 = vector.shape_cast %444 : vector<8x128xf32> to vector<1x1x8x128xf32>
    tpu.vector_store %arg4[%c0_70, %c5_71, %c0_72, %c0_73], %447 {strides = array<i32>} : memref<1x8x8x128xf32, #tpu.memory_space<vmem>>, vector<1x1x8x128xf32>,
    %c0_74 = arith.constant 0 : index
    %c6_75 = arith.constant 6 : index
    %c0_76 = arith.constant 0 : index
    %c0_77 = arith.constant 0 : index
    %448 = vector.load %arg4[%c0_74, %c6_75, %c0_76, %c0_77] : memref<1x8x8x128xf32, #tpu.memory_space<vmem>>, vector<1x1x8x128xf32>
    %449 = vector.shape_cast %448 : vector<1x1x8x128xf32> to vector<8x128xf32>
    %450 = arith.addf %449, %406 : vector<8x128xf32>
    %c0_78 = arith.constant 0 : index
    %c6_79 = arith.constant 6 : index
    %c0_80 = arith.constant 0 : index
    %c0_81 = arith.constant 0 : index
    %451 = vector.load %arg4[%c0_78, %c6_79, %c0_80, %c0_81] : memref<1x8x8x128xf32, #tpu.memory_space<vmem>>, vector<1x1x8x128xf32>
    %452 = vector.shape_cast %451 : vector<1x1x8x128xf32> to vector<8x128xf32>
    %453 = vector.shape_cast %450 : vector<8x128xf32> to vector<1x1x8x128xf32>
    tpu.vector_store %arg4[%c0_78, %c6_79, %c0_80, %c0_81], %453 {strides = array<i32>} : memref<1x8x8x128xf32, #tpu.memory_space<vmem>>, vector<1x1x8x128xf32>,
    %c0_82 = arith.constant 0 : index
    %c7_83 = arith.constant 7 : index
    %c0_84 = arith.constant 0 : index
    %c0_85 = arith.constant 0 : index
    %454 = vector.load %arg4[%c0_82, %c7_83, %c0_84, %c0_85] : memref<1x8x8x128xf32, #tpu.memory_space<vmem>>, vector<1x1x8x128xf32>
    %455 = vector.shape_cast %454 : vector<1x1x8x128xf32> to vector<8x128xf32>
    %456 = arith.addf %455, %411 : vector<8x128xf32>
    %c0_86 = arith.constant 0 : index
    %c7_87 = arith.constant 7 : index
    %c0_88 = arith.constant 0 : index
    %c0_89 = arith.constant 0 : index
    %457 = vector.load %arg4[%c0_86, %c7_87, %c0_88, %c0_89] : memref<1x8x8x128xf32, #tpu.memory_space<vmem>>, vector<1x1x8x128xf32>
    %458 = vector.shape_cast %457 : vector<1x1x8x128xf32> to vector<8x128xf32>
    %459 = vector.shape_cast %456 : vector<8x128xf32> to vector<1x1x8x128xf32>
    tpu.vector_store %arg4[%c0_86, %c7_87, %c0_88, %c0_89], %459 {strides = array<i32>} : memref<1x8x8x128xf32, #tpu.memory_space<vmem>>, vector<1x1x8x128xf32>,
    return
  }
  func.func @transform_0(%arg0: i32, %arg1: i32, %arg2: memref<10xf32, #tpu.memory_space<smem>>) -> (i32, i32) {
    %c1_i32 = arith.constant 1 : i32
    %0 = arith.muli %arg0, %c1_i32 : i32
    %1 = arith.addi %0, %arg1 : i32
    %c0_i32 = arith.constant 0 : i32
    %c0_i32_0 = arith.constant 0 : i32
    return %1, %c0_i32 : i32, i32
  }
  func.func @transform_1(%arg0: i32, %arg1: i32, %arg2: memref<10xf32, #tpu.memory_space<smem>>) -> (i32, i32, i32, i32) {
    %c0_i32 = arith.constant 0 : i32
    %c0_i32_0 = arith.constant 0 : i32
    %c0_i32_1 = arith.constant 0 : i32
    %c0_i32_2 = arith.constant 0 : i32
    return %arg0, %c0_i32, %c0_i32_0, %c0_i32_1 : i32, i32, i32, i32
  }
}

</mosaic_0001>

<bundles_post_ra>
// kernel: tpu_custom_call.1
= control target key start
LH: loop header
LB: loop body
LE: loop exit
PB: predicated region body
PF: predicated region fallthrough
CT: control target
= control target key end

     0   :  { %s950_s0 = inlined_call_operand.hbm [shape: f32[10], index: 0, kind: input, shape index: {}]   ;;  %s951_s1 = inlined_call_operand.hbm [shape: f32[64,128], index: 1, kind: input, shape index: {}]   ;;  %s952_s2 = inlined_call_operand.hbm [shape: f32[1,8,8,128], index: 2, kind: output, shape index: {}]  }
   0x1   :  { %s565_s11 = scalar_lea.hbm %s950_s0, 16 }
   0x2   :  { %p566_p0 = scmp.ne.s32.totalorder %s950_s0, %s565_s11  ;;  %p569_p1 = scmp.lt.u32.totalorder %s565_s11, %s950_s0 }
   0x4   :  { %p571_p2 = pnand %p569_p1, %p566_p0 }
   0x6   :  { %574 = shalt.err (!%p571_p2)  }
   0x7   :  { %s625_s16 = smov [#allocation3]  }
   0x8   :  { %8 = dma.hbm_to_smem %s950_s0, 16, %s625_s16, [#allocation2] }
   0x9   :  { %619 = dma.done.wait [#allocation2], 16 }
   0xa   :  { %620 = vsyncadd [#allocation2], 4294967280 }
   0xb   :  { %10 = sfence }
   0xc   :  { %11 = vsyncpa [#allocation5], 0 }
   0xd   :  { %12 = vsyncpa [#allocation6], 0  ;;  %s626_s19 = smov [#allocation4]   ;;  %s575_s23 = scalar_lea.hbm %s951_s1, 1024 }
   0xe   :  { %s22_s20 = sshll.u32 %s626_s19, 4  ;;  %p576_p3 = scmp.ne.s32.totalorder %s951_s1, %s575_s23  ;;  %s23_s20 = int_to_ptr.vmem [resolvable:$true] %s22_s20 }
   0xf   :  { %p579_p4 = scmp.lt.u32.totalorder %s575_s23, %s951_s1 }
  0x11   :  { %p581_p5 = pnand %p579_p4, %p576_p3 }
  0x13   :  { %584 = shalt.err (!%p581_p5)
}
  0x14   :  { %s585_s0 = scalar_lea.vmem %s23_s20, 1024  ;;  %p590_p7 = scmp.lt.s32.totalorder %s23_s20, %s23_s20 }
  0x15   :  { %p586_p6 = scmp.ne.s32.totalorder %s23_s20, %s585_s0  ;;  %p591_p8 = scmp.lt.s32.totalorder %s585_s0, %s585_s0 }
  0x17   :  { %p592_p9 = por %p591_p8, %p590_p7 }
  0x19   :  { %p593_p10 = pnand %p592_p9, %p586_p6 }
  0x1b   :  { %596 = shalt.err (!%p593_p10)
}
  0x1c   :  { %s627_s28 = smov 128   ;;  %s628_s29 = smov 8  }
  0x1d   :  { %28 = dma.hbm_to_vmem [thread:$0]  %s951_s1, 1024, %s23_s20, [#allocation5], %s627_s28, %s627_s28, %s628_s29  }
  0x1e   :  { %621 = dma.done.wait [#allocation5], 1024  }
  0x1f   :  { %622 = vsyncadd [#allocation5], 4294966272  ;;  %s46_s4 = sld [smem:[#allocation3]]  ;;  %s407_s5 = sld [smem:[#allocation3 + $0x1]]  ;;  %v55_v0 = vld [vmem:[#allocation4] sm:$0xff]  ;;  %v101_v3 = vld [vmem:[#allocation4 + $0x8] sm:$0xff] }
  0x20   :  { %v138_v4 = vld [vmem:[#allocation4 + $0x10] sm:$0xff]  ;;  %v672_v5 = vmul.f32 10.0, %v55_v0  ;;  %v674_v6 = vmul.f32 10.0, %v101_v3  ;;  %v175_v8 = vld [vmem:[#allocation4 + $0x18] sm:$0xff]  ;;  %v212_v9 = vld [vmem:[#allocation4 + $0x20] sm:$0xff]  ;;  %s408_s1 = sld [smem:[#allocation3 + $0x2]] }
  0x21   :  { %v676_v7 = vmul.f32 10.0, %v138_v4  ;;  %v681_v13 = vmul.f32 10.0, %v175_v8  ;;  %v249_v15 = vld [vmem:[#allocation4 + $0x28] sm:$0xff]  ;;  %v685_v17 = vmul.f32 10.0, %v212_v9  ;;  %v286_v19 = vld [vmem:[#allocation4 + $0x30] sm:$0xff]  ;;  %v323_v23 = vld [vmem:[#allocation4 + $0x38] sm:$0xff] }
  0x22   :  { %v689_v21 = vmul.f32 10.0, %v249_v15  ;;  %v693_v25 = vmul.f32 10.0, %v286_v19  ;;  %v697_v28 = vmul.f32 10.0, %v323_v23  ;;  %s409_s6 = sld [smem:[#allocation3 + $0x3]]  ;;  %s718_s7 = sld [smem:[#allocation3 + $0x4]] }
  0x23   :  { %s733_s8 = sld [smem:[#allocation3 + $0x5]]  ;;  %s764_s9 = sld [smem:[#allocation3 + $0x6]] }
  0x24   :  { %s785_s10 = sld [smem:[#allocation3 + $0x7]]  ;;  %s845_s11 = sld [smem:[#allocation3 + $0x8]] }
  0x25   :  { %v57_v1 = vstv %s46_s4  ;;  %v60_v2 = vstv %s407_s5  ;;  %s629_s12 = smov [#allocation7]  }
  0x26   :  { %v58_v10 = vadd.f32 %v57_v1, %v672_v5  ;;  %v61_v11 = vadd.f32 %v60_v2, %v672_v5  ;;  %v103_v12 = vadd.f32 %v674_v6, %v57_v1  ;;  %v105_v14 = vadd.f32 %v674_v6, %v60_v2  ;;  %s395_s13 = sshll.u32 %s629_s12, 4  ;;  %s396_s13 = int_to_ptr.vmem [resolvable:$true] %s395_s13 }
  0x27   :  { %v140_v16 = vadd.f32 %v676_v7, %v57_v1  ;;  %v142_v18 = vadd.f32 %v676_v7, %v60_v2  ;;  %v177_v20 = vadd.f32 %v681_v13, %v57_v1  ;;  %v179_v22 = vadd.f32 %v681_v13, %v60_v2  ;;  %s597_s14 = scalar_lea.vmem %s396_s13, 1024  ;;  %p602_p12 = scmp.lt.s32.totalorder %s396_s13, %s396_s13 }
  0x28   :  { %421 = vtanh.f32 %v58_v10  ;;  %v214_v24 = vadd.f32 %v685_v17, %v57_v1  ;;  %v216_v26 = vadd.f32 %v685_v17, %v60_v2  ;;  %v251_v27 = vadd.f32 %v689_v21, %v57_v1  ;;  %p598_p11 = scmp.ne.s32.totalorder %s396_s13, %s597_s14  ;;  %p603_p13 = scmp.lt.s32.totalorder %s597_s14, %s597_s14 }
  0x29   :  { %423 = vtanh.f32 %v61_v11  ;;  %v253_v29 = vadd.f32 %v689_v21, %v60_v2  ;;  %v288_v30 = vadd.f32 %v693_v25, %v57_v1  ;;  %v290_v31 = vadd.f32 %v693_v25, %v60_v2 }
  0x2a   :  { %425 = vtanh.f32 %v103_v12  ;;  %v65_v32 = vstv %s408_s1  ;;  %v325_v34 = vadd.f32 %v697_v28, %v57_v1  ;;  %v327_v36 = vadd.f32 %v697_v28, %v60_v2  ;;  %p604_p0 = por %p603_p13, %p602_p12 }
  0x2b   :  { %427 = vtanh.f32 %v105_v14  ;;  %v66_v39 = vadd.f32 %v65_v32, %v672_v5  ;;  %v109_v41 = vadd.f32 %v674_v6, %v65_v32  ;;  %v146_v44 = vadd.f32 %v676_v7, %v65_v32 }
  0x2c   :  { %429 = vtanh.f32 %v140_v16  ;;  %v183_v46 = vadd.f32 %v681_v13, %v65_v32  ;;  %v220_v50 = vadd.f32 %v685_v17, %v65_v32  ;;  %v257_v52 = vadd.f32 %v689_v21, %v65_v32  ;;  %p605_p1 = pnand %p604_p0, %p598_p11 }
  0x2d   :  { %431 = vtanh.f32 %v142_v18  ;;  %v70_v53 = vstv %s409_s6  ;;  %v294_v57 = vadd.f32 %v693_v25, %v65_v32  ;;  %v331_v59 = vadd.f32 %v697_v28, %v65_v32 }
  0x2e   :  { %433 = vtanh.f32 %v177_v20  ;;  %v71_v63 = vadd.f32 %v70_v53, %v672_v5  ;;  %v113_v1 = vadd.f32 %v674_v6, %v70_v53  ;;  %v150_v8 = vadd.f32 %v676_v7, %v70_v53 }
  0x2f   :  { %435 = vtanh.f32 %v179_v22  ;;  %v187_v10 = vadd.f32 %v681_v13, %v70_v53  ;;  %v224_v11 = vadd.f32 %v685_v17, %v70_v53  ;;  %v75_v16 = vstv %s718_s7 }
  0x30   :  { %437 = vtanh.f32 %v214_v24  ;;  %v261_v19 = vadd.f32 %v689_v21, %v70_v53  ;;  %v298_v24 = vadd.f32 %v693_v25, %v70_v53 }
  0x31   :  { %439 = vtanh.f32 %v216_v26 }
  0x32   :  { %v422_v33 = vpop.eup %421  ;;  %441 = vtanh.f32 %v251_v27 }
  0x33   :  { %v703_v35 = vpop.eup %423  ;;  %443 = vtanh.f32 %v253_v29  ;;  %v335_v29 = vadd.f32 %v697_v28, %v70_v53 }
  0x34   :  { %v426_v37 = vpop.eup %425  ;;  %v63_v38 = vsub.f32 %v422_v33, %v703_v35  ;;  %445 = vtanh.f32 %v288_v30  ;;  %v76_v30 = vadd.f32 %v75_v16, %v672_v5 }
  0x35   :  { %v708_v40 = vpop.eup %427  ;;  %447 = vtanh.f32 %v290_v31 }
  0x36   :  { %v430_v42 = vpop.eup %429  ;;  %v107_v43 = vsub.f32 %v426_v37, %v708_v40  ;;  %449 = vtanh.f32 %v325_v34  ;;  %v117_v34 = vadd.f32 %v674_v6, %v75_v16 }
  0x37   :  { %v713_v45 = vpop.eup %431  ;;  %451 = vtanh.f32 %v327_v36 }
  0x38   :  { %v434_v47 = vpop.eup %433  ;;  %v108_v48 = vadd.f32 %v107_v43, %v63_v38  ;;  %v144_v49 = vsub.f32 %v430_v42, %v713_v45  ;;  %453 = vtanh.f32 %v66_v39  ;;  %v80_v38 = vstv %s733_s8 }
  0x39   :  { %v720_v51 = vpop.eup %435  ;;  %455 = vtanh.f32 %v109_v41  ;;  %v191_v43 = vadd.f32 %v681_v13, %v75_v16  ;;  %v121_v53 = vadd.f32 %v674_v6, %v80_v38 }
  0x3a   :  { %v438_v54 = vpop.eup %437  ;;  %v145_v55 = vadd.f32 %v144_v49, %v108_v48  ;;  %v181_v56 = vsub.f32 %v434_v47, %v720_v51  ;;  %457 = vtanh.f32 %v146_v44  ;;  %v228_v44 = vadd.f32 %v685_v17, %v75_v16 }
  0x3b   :  { %v725_v58 = vpop.eup %439  ;;  %459 = vtanh.f32 %v183_v46  ;;  %v302_v49 = vadd.f32 %v693_v25, %v75_v16 }
  0x3c   :  { %v442_v60 = vpop.eup %441  ;;  %v182_v61 = vadd.f32 %v181_v56, %v145_v55  ;;  %v218_v62 = vsub.f32 %v438_v54, %v725_v58  ;;  %461 = vtanh.f32 %v220_v50 }
  0x3d   :  { %v730_v0 = vpop.eup %443  ;;  %463 = vtanh.f32 %v257_v52  ;;  %v81_v52 = vadd.f32 %v80_v38, %v672_v5 }
  0x3e   :  { %v446_v2 = vpop.eup %445  ;;  %v219_v3 = vadd.f32 %v218_v62, %v182_v61  ;;  %v255_v4 = vsub.f32 %v442_v60, %v730_v0  ;;  %465 = vtanh.f32 %v294_v57  ;;  %v158_v57 = vadd.f32 %v676_v7, %v80_v38 }
  0x3f   :  { %v737_v9 = vpop.eup %447  ;;  %467 = vtanh.f32 %v331_v59  ;;  %v195_v60 = vadd.f32 %v681_v13, %v80_v38  ;;  %v232_v61 = vadd.f32 %v685_v17, %v80_v38 }
  0x40   :  { %v450_v12 = vpop.eup %449  ;;  %v256_v14 = vadd.f32 %v255_v4, %v219_v3  ;;  %v292_v15 = vsub.f32 %v446_v2, %v737_v9  ;;  %469 = vtanh.f32 %v71_v63 }
  0x41   :  { %v743_v18 = vpop.eup %451  ;;  %471 = vtanh.f32 %v113_v1 }
  0x42   :  { %v746_v20 = vpop.eup %453  ;;  %v293_v22 = vadd.f32 %v292_v15, %v256_v14  ;;  %v329_v23 = vsub.f32 %v450_v12, %v743_v18  ;;  %473 = vtanh.f32 %v150_v8  ;;  %v85_v8 = vstv %s764_s9 }
  0x43   :  { %v456_v26 = vpop.eup %455  ;;  %v68_v27 = vsub.f32 %v703_v35, %v746_v20  ;;  %475 = vtanh.f32 %v187_v10  ;;  %v154_v35 = vadd.f32 %v676_v7, %v75_v16  ;;  %v269_v15 = vadd.f32 %v689_v21, %v80_v38 }
  0x44   :  { %v754_v31 = vpop.eup %457  ;;  %v330_v32 = vadd.f32 %v329_v23, %v293_v22  ;;  %v111_v33 = vsub.f32 %v708_v40, %v456_v26  ;;  %477 = vtanh.f32 %v224_v11 }
  0x45   :  { %v758_v36 = vpop.eup %459  ;;  %v148_v37 = vsub.f32 %v713_v45, %v754_v31  ;;  %479 = vtanh.f32 %v261_v19  ;;  %v265_v45 = vadd.f32 %v689_v21, %v75_v16 }
  0x46   :  { %v766_v39 = vpop.eup %461  ;;  %v112_v41 = vadd.f32 %v111_v33, %v68_v27  ;;  %v185_v40 = vsub.f32 %v720_v51, %v758_v36  ;;  %481 = vtanh.f32 %v298_v24  ;;  %361 = vst [vmem:[#allocation7] sm:$0xff] %v330_v32  ;;  %v339_v51 = vadd.f32 %v697_v28, %v75_v16 }
  0x47   :  { %v770_v42 = vpop.eup %463  ;;  %483 = vtanh.f32 %v335_v29  ;;  %v222_v48 = vsub.f32 %v725_v58, %v766_v39  ;;  %v306_v16 = vadd.f32 %v693_v25, %v80_v38  ;;  %v125_v27 = vadd.f32 %v674_v6, %v85_v8 }
  0x48   :  { %v775_v46 = vpop.eup %465  ;;  %v149_v47 = vadd.f32 %v148_v37, %v112_v41  ;;  %485 = vtanh.f32 %v76_v30  ;;  %v259_v56 = vsub.f32 %v730_v0, %v770_v42  ;;  %v825_v29 = vstv %s785_s10 }
  0x49   :  { %v780_v50 = vpop.eup %467  ;;  %487 = vtanh.f32 %v117_v34  ;;  %v296_v1 = vsub.f32 %v737_v9, %v775_v46 }
  0x4a   :  { %v787_v54 = vpop.eup %469  ;;  %v186_v55 = vadd.f32 %v185_v40, %v149_v47  ;;  %489 = vtanh.f32 %v154_v35  ;;  %v333_v3 = vsub.f32 %v743_v18, %v780_v50  ;;  %v343_v18 = vadd.f32 %v697_v28, %v80_v38 }
  0x4b   :  { %v472_v58 = vpop.eup %471  ;;  %v73_v59 = vsub.f32 %v746_v20, %v787_v54  ;;  %491 = vtanh.f32 %v191_v43  ;;  %v162_v35 = vadd.f32 %v676_v7, %v85_v8 }
  0x4c   :  { %v796_v62 = vpop.eup %473  ;;  %v223_v63 = vadd.f32 %v222_v48, %v186_v55  ;;  %v115_v0 = vsub.f32 %v456_v26, %v472_v58  ;;  %493 = vtanh.f32 %v228_v44  ;;  %v86_v26 = vadd.f32 %v85_v8, %v672_v5 }
  0x4d   :  { %v800_v2 = vpop.eup %475  ;;  %v152_v4 = vsub.f32 %v754_v31, %v796_v62  ;;  %495 = vtanh.f32 %v265_v45  ;;  %v199_v44 = vadd.f32 %v681_v13, %v85_v8 }
  0x4e   :  { %v807_v10 = vpop.eup %477  ;;  %v260_v11 = vadd.f32 %v259_v56, %v223_v63  ;;  %v116_v12 = vadd.f32 %v115_v0, %v73_v59  ;;  %v189_v14 = vsub.f32 %v758_v36, %v800_v2  ;;  %497 = vtanh.f32 %v302_v49 }
  0x4f   :  { %v811_v9 = vpop.eup %479  ;;  %499 = vtanh.f32 %v339_v51  ;;  %v226_v23 = vsub.f32 %v766_v39, %v807_v10  ;;  %v273_v51 = vadd.f32 %v689_v21, %v85_v8  ;;  %v91_v59 = vadd.f32 %v825_v29, %v672_v5 }
  0x50   :  { %v816_v19 = vpop.eup %481  ;;  %v297_v20 = vadd.f32 %v296_v1, %v260_v11  ;;  %v153_v22 = vadd.f32 %v152_v4, %v116_v12  ;;  %501 = vtanh.f32 %v81_v52  ;;  %v263_v33 = vsub.f32 %v770_v42, %v811_v9 }
  0x51   :  { %v820_v24 = vpop.eup %483  ;;  %503 = vtanh.f32 %v121_v53  ;;  %v300_v36 = vsub.f32 %v775_v46, %v816_v19  ;;  %v310_v52 = vadd.f32 %v693_v25, %v85_v8  ;;  %v166_v4 = vadd.f32 %v676_v7, %v825_v29 }
  0x52   :  { %v827_v30 = vpop.eup %485  ;;  %v334_v31 = vadd.f32 %v333_v3, %v297_v20  ;;  %v190_v32 = vadd.f32 %v189_v14, %v153_v22  ;;  %505 = vtanh.f32 %v158_v57  ;;  %v337_v42 = vsub.f32 %v780_v50, %v820_v24 }
  0x53   :  { %v488_v34 = vpop.eup %487  ;;  %v78_v37 = vsub.f32 %v787_v54, %v827_v30  ;;  %507 = vtanh.f32 %v195_v60  ;;  %v236_v50 = vadd.f32 %v685_v17, %v85_v8  ;;  %v129_v60 = vadd.f32 %v674_v6, %v825_v29 }
  0x54   :  { %v836_v38 = vpop.eup %489  ;;  %v227_v39 = vadd.f32 %v226_v23, %v190_v32  ;;  %v119_v41 = vsub.f32 %v472_v58, %v488_v34  ;;  %509 = vtanh.f32 %v232_v61  ;;  %365 = vst [vmem:[#allocation7 + $0x8] sm:$0xff] %v334_v31  ;;  %v347_v58 = vadd.f32 %v697_v28, %v85_v8 }
  0x55   :  { %v838_v40 = vpop.eup %491  ;;  %v156_v43 = vsub.f32 %v796_v62, %v836_v38  ;;  %511 = vtanh.f32 %v269_v15  ;;  %v883_v15 = vstv %s845_s11  ;;  %v203_v23 = vadd.f32 %v681_v13, %v825_v29 }
  0x56   :  { %v847_v45 = vpop.eup %493  ;;  %v264_v46 = vadd.f32 %v263_v33, %v227_v39  ;;  %v120_v47 = vadd.f32 %v119_v41, %v78_v37  ;;  %v193_v48 = vsub.f32 %v800_v2, %v838_v40  ;;  %513 = vtanh.f32 %v306_v16 }
  0x57   :  { %v851_v49 = vpop.eup %495  ;;  %515 = vtanh.f32 %v343_v18  ;;  %v230_v56 = vsub.f32 %v807_v10, %v847_v45  ;;  %v96_v37 = vadd.f32 %v883_v15, %v672_v5 }
  0x58   :  { %v856_v53 = vpop.eup %497  ;;  %v301_v54 = vadd.f32 %v300_v36, %v264_v46  ;;  %v157_v55 = vadd.f32 %v156_v43, %v120_v47  ;;  %517 = vtanh.f32 %v86_v26  ;;  %v267_v1 = vsub.f32 %v811_v9, %v851_v49 }
  0x59   :  { %v860_v57 = vpop.eup %499  ;;  %519 = vtanh.f32 %v125_v27  ;;  %v304_v2 = vsub.f32 %v816_v19, %v856_v53  ;;  %v277_v26 = vadd.f32 %v689_v21, %v825_v29  ;;  %v351_v36 = vadd.f32 %v697_v28, %v825_v29 }
  0x5a   :  { %v867_v61 = vpop.eup %501  ;;  %v338_v62 = vadd.f32 %v337_v42, %v301_v54  ;;  %v194_v63 = vadd.f32 %v193_v48, %v157_v55  ;;  %521 = vtanh.f32 %v162_v35  ;;  %v341_v14 = vsub.f32 %v820_v24, %v860_v57 }
  0x5b   :  { %v504_v0 = vpop.eup %503  ;;  %v83_v3 = vsub.f32 %v827_v30, %v867_v61  ;;  %523 = vtanh.f32 %v199_v44  ;;  %v240_v24 = vadd.f32 %v685_v17, %v825_v29  ;;  %v207_v54 = vadd.f32 %v681_v13, %v883_v15 }
  0x5c   :  { %v506_v8 = vpop.eup %505  ;;  %v231_v10 = vadd.f32 %v230_v56, %v194_v63  ;;  %v123_v11 = vsub.f32 %v488_v34, %v504_v0  ;;  %525 = vtanh.f32 %v236_v50  ;;  %369 = vst [vmem:[#allocation7 + $0x10] sm:$0xff] %v338_v62  ;;  %v314_v34 = vadd.f32 %v693_v25, %v825_v29 }
  0x5d   :  { %v877_v12 = vpop.eup %507  ;;  %v160_v9 = vsub.f32 %v836_v38, %v506_v8  ;;  %527 = vtanh.f32 %v273_v51  ;;  %v133_v29 = vadd.f32 %v674_v6, %v883_v15  ;;  %v244_v55 = vadd.f32 %v685_v17, %v883_v15 }
  0x5e   :  { %v885_v16 = vpop.eup %509  ;;  %v268_v18 = vadd.f32 %v267_v1, %v231_v10  ;;  %v124_v19 = vadd.f32 %v123_v11, %v83_v3  ;;  %v197_v20 = vsub.f32 %v838_v40, %v877_v12  ;;  %529 = vtanh.f32 %v310_v52 }
  0x5f   :  { %v889_v22 = vpop.eup %511  ;;  %531 = vtanh.f32 %v347_v58  ;;  %v234_v32 = vsub.f32 %v847_v45, %v885_v16  ;;  %v355_v11 = vadd.f32 %v697_v28, %v883_v15 }
  0x60   :  { %v897_v27 = vpop.eup %513  ;;  %v305_v30 = vadd.f32 %v304_v2, %v268_v18  ;;  %v161_v31 = vadd.f32 %v160_v9, %v124_v19  ;;  %533 = vtanh.f32 %v91_v59  ;;  %v271_v41 = vsub.f32 %v851_v49, %v889_v22 }
  0x61   :  { %v901_v33 = vpop.eup %515  ;;  %535 = vtanh.f32 %v129_v60  ;;  %v308_v42 = vsub.f32 %v856_v53, %v897_v27  ;;  %v170_v49 = vadd.f32 %v676_v7, %v883_v15  ;;  %v281_v60 = vadd.f32 %v689_v21, %v883_v15 }
  0x62   :  { %v518_v35 = vpop.eup %517  ;;  %v342_v38 = vadd.f32 %v341_v14, %v305_v30  ;;  %v198_v39 = vadd.f32 %v197_v20, %v161_v31  ;;  %537 = vtanh.f32 %v166_v4  ;;  %v345_v47 = vsub.f32 %v860_v57, %v901_v33 }
  0x63   :  { %v520_v40 = vpop.eup %519  ;;  %v88_v43 = vsub.f32 %v867_v61, %v518_v35  ;;  %539 = vtanh.f32 %v203_v23  ;;  %v318_v2 = vadd.f32 %v693_v25, %v883_v15 }
  0x64   :  { %v522_v44 = vpop.eup %521  ;;  %v235_v45 = vadd.f32 %v234_v32, %v198_v39  ;;  %v127_v5 = vsub.f32 %v504_v0, %v520_v40  ;;  %541 = vtanh.f32 %v240_v24  ;;  %373 = vst [vmem:[#allocation7 + $0x18] sm:$0xff] %v342_v38 }
  0x65   :  { %v524_v46 = vpop.eup %523  ;;  %v164_v48 = vsub.f32 %v506_v8, %v522_v44  ;;  %543 = vtanh.f32 %v277_v26 }
  0x66   :  { %v526_v50 = vpop.eup %525  ;;  %v272_v51 = vadd.f32 %v271_v41, %v235_v45  ;;  %v128_v52 = vadd.f32 %v127_v5, %v88_v43  ;;  %v201_v53 = vsub.f32 %v877_v12, %v524_v46  ;;  %545 = vtanh.f32 %v314_v34 }
  0x67   :  { %v528_v6 = vpop.eup %527  ;;  %547 = vtanh.f32 %v351_v36  ;;  %v238_v7 = vsub.f32 %v885_v16, %v526_v50 }
  0x68   :  { %v530_v56 = vpop.eup %529  ;;  %v309_v57 = vadd.f32 %v308_v42, %v272_v51  ;;  %v165_v58 = vadd.f32 %v164_v48, %v128_v52  ;;  %549 = vtanh.f32 %v96_v37  ;;  %v275_v1 = vsub.f32 %v889_v22, %v528_v6 }
  0x69   :  { %v532_v59 = vpop.eup %531  ;;  %551 = vtanh.f32 %v133_v29  ;;  %v312_v17 = vsub.f32 %v897_v27, %v530_v56 }
  0x6a   :  { %v534_v61 = vpop.eup %533  ;;  %v346_v62 = vadd.f32 %v345_v47, %v309_v57  ;;  %v202_v63 = vadd.f32 %v201_v53, %v165_v58  ;;  %553 = vtanh.f32 %v170_v49  ;;  %v349_v9 = vsub.f32 %v901_v33, %v532_v59 }
  0x6b   :  { %v536_v13 = vpop.eup %535  ;;  %v93_v0 = vsub.f32 %v518_v35, %v534_v61  ;;  %555 = vtanh.f32 %v207_v54 }
  0x6c   :  { %v538_v3 = vpop.eup %537  ;;  %v239_v4 = vadd.f32 %v238_v7, %v202_v63  ;;  %v131_v8 = vsub.f32 %v520_v40, %v536_v13  ;;  %557 = vtanh.f32 %v244_v55  ;;  %377 = vst [vmem:[#allocation7 + $0x20] sm:$0xff] %v346_v62 }
  0x6d   :  { %v540_v10 = vpop.eup %539  ;;  %v168_v21 = vsub.f32 %v522_v44, %v538_v3  ;;  %559 = vtanh.f32 %v281_v60 }
  0x6e   :  { %v542_v12 = vpop.eup %541  ;;  %v276_v14 = vadd.f32 %v275_v1, %v239_v4  ;;  %v132_v16 = vadd.f32 %v131_v8, %v93_v0  ;;  %v205_v18 = vsub.f32 %v524_v46, %v540_v10  ;;  %561 = vtanh.f32 %v318_v2 }
  0x6f   :  { %v544_v19 = vpop.eup %543  ;;  %v242_v23 = vsub.f32 %v526_v50, %v542_v12  ;;  %563 = vtanh.f32 %v355_v11 }
  0x70   :  { %v546_v25 = vpop.eup %545  ;;  %v313_v20 = vadd.f32 %v312_v17, %v276_v14  ;;  %v169_v22 = vadd.f32 %v168_v21, %v132_v16  ;;  %v279_v31 = vsub.f32 %v528_v6, %v544_v19 }
  0x71   :  { %v548_v24 = vpop.eup %547  ;;  %v316_v36 = vsub.f32 %v530_v56, %v546_v25 }
  0x72   :  { %v550_v26 = vpop.eup %549  ;;  %v350_v27 = vadd.f32 %v349_v9, %v313_v20  ;;  %v206_v30 = vadd.f32 %v205_v18, %v169_v22  ;;  %v353_v41 = vsub.f32 %v532_v59, %v548_v24 }
  0x73   :  { %v552_v28 = vpop.eup %551  ;;  %v98_v15 = vsub.f32 %v534_v61, %v550_v26 }
  0x74   :  { %v554_v32 = vpop.eup %553  ;;  %v243_v34 = vadd.f32 %v242_v23, %v206_v30  ;;  %v135_v33 = vsub.f32 %v536_v13, %v552_v28  ;;  %381 = vst [vmem:[#allocation7 + $0x28] sm:$0xff] %v350_v27 }
  0x75   :  { %v556_v37 = vpop.eup %555  ;;  %v172_v35 = vsub.f32 %v538_v3, %v554_v32 }
  0x76   :  { %v558_v38 = vpop.eup %557  ;;  %v280_v39 = vadd.f32 %v279_v31, %v243_v34  ;;  %v136_v40 = vadd.f32 %v135_v33, %v98_v15  ;;  %v209_v42 = vsub.f32 %v540_v10, %v556_v37 }
  0x77   :  { %v560_v43 = vpop.eup %559  ;;  %v246_v45 = vsub.f32 %v542_v12, %v558_v38 }
  0x78   :  { %v317_v29 = vadd.f32 %v316_v36, %v280_v39  ;;  %v173_v44 = vadd.f32 %v172_v35, %v136_v40  ;;  %v562_v5 = vpop.eup %561  ;;  %v283_v48 = vsub.f32 %v544_v19, %v560_v43 }
  0x79   :  { %v564_v49 = vpop.eup %563  ;;  %v320_v51 = vsub.f32 %v546_v25, %v562_v5 }
  0x7a   :  { %v354_v46 = vadd.f32 %v353_v41, %v317_v29  ;;  %v210_v47 = vadd.f32 %v209_v42, %v173_v44  ;;  %v357_v53 = vsub.f32 %v548_v24, %v564_v49 }
  0x7c   :  { %v247_v50 = vadd.f32 %v246_v45, %v210_v47  ;;  %385 = vst [vmem:[#allocation7 + $0x30] sm:$0xff] %v354_v46 }
  0x7e   :  { %v284_v52 = vadd.f32 %v283_v48, %v247_v50 }
  0x80   :  { %v321_v6 = vadd.f32 %v320_v51, %v284_v52 }
  0x82   :  { %v358_v54 = vadd.f32 %v357_v53, %v321_v6 }
  0x84   :  { %389 = vst [vmem:[#allocation7 + $0x38] sm:$0xff] %v358_v54 }
  0x85   :  { %608 = shalt.err (!%p605_p1)
}
  0x86   :  { %s609_s17 = scalar_lea.hbm %s952_s2, 1024 }
  0x87   :  { %p610_p2 = scmp.ne.s32.totalorder %s952_s2, %s609_s17  ;;  %p613_p3 = scmp.lt.u32.totalorder %s609_s17, %s952_s2 }
  0x89   :  { %p615_p4 = pnand %p613_p3, %p610_p2 }
  0x8b   :  { %618 = shalt.err (!%p615_p4)
}
  0x8c   :  { %401 = dma.vmem_to_hbm [thread:$0]  %s396_s13, 1024, %s952_s2, [#allocation6], %s627_s28, %s627_s28, %s628_s29  }
  0x8d   :  { %623 = dma.done.wait [#allocation6], 1024  }
  0x8e   :  { %624 = vsyncadd [#allocation6], 4294966272 }
  0x8f   :  { %405 = vsyncpa [#allocation5], 1 }
  0x90   :  { %406 = vsyncpa [#allocation6], 1 }

</bundles_post_ra>
